<compile_context>
chip_gen: v5e
topology: v5e:2x2
jax: 0.10.0
libtpu: 0.0.40
codegen_flags: <defaults>
</compile_context>

<pallas_src>
import functools

import jax
import jax.numpy as jnp
from jax.experimental import pallas as pl
from jax.experimental.pallas import tpu as pltpu


def _round_up(x, m):
    return (x + m - 1) // m * m


def _vmem_limit(block_bytes):
    # double-buffered blocks + headroom, clamped under v7x's 64 MiB physical VMEM.
    return int(min(56 * 1024 * 1024, max(8 * 1024 * 1024, 2 * block_bytes + (2 << 20))))


# ----------------- stage 1: Linear1 + ReLU + BN partial statistics -----------------

def _stage1_kernel(x_ref, w1_ref, b1_ref, h1_ref, psum_ref, psumsq_ref, *,
                   valid_b, tile_b):
    i = pl.program_id(0)

    # MXU matmul (operands in compute dtype), f32 accumulate; elementwise in f32.
    h1 = jnp.dot(x_ref[...], w1_ref[...], preferred_element_type=jnp.float32)
    h1 = jnp.maximum(h1 + b1_ref[...], 0.0)
    h1_ref[...] = h1.astype(h1_ref.dtype)

    # Batch was padded to a tile multiple; padded x rows are zero but
    # relu(b1) != 0, so mask them out of the statistics.
    row = i * tile_b + jax.lax.broadcasted_iota(jnp.int32, h1.shape, 0)
    h1m = jnp.where(row < valid_b, h1, 0.0)

    # One-pass stats: sum and sum of squares (var = E[x^2] - mean^2 in wrapper).
    psum_ref[...] = jnp.sum(h1m, axis=0, keepdims=True)[None]
    psumsq_ref[...] = jnp.sum(h1m * h1m, axis=0, keepdims=True)[None]


# ----------------- stage 2: BN apply + Linear2 + ReLU + Linear3 -----------------

def _stage2_kernel(h1_ref, scale_ref, shift_ref, w2_ref, b2_ref, w3_ref, b3_ref,
                   o_ref):
    # BN folded into scale/shift; keep the elementwise work in f32.
    h1n = h1_ref[...].astype(jnp.float32) * scale_ref[...] + shift_ref[...]

    h2 = jnp.dot(h1n.astype(w2_ref.dtype), w2_ref[...],
                 preferred_element_type=jnp.float32)
    h2 = jnp.maximum(h2 + b2_ref[...], 0.0)

    out = jnp.dot(h2.astype(w3_ref.dtype), w3_ref[...],
                  preferred_element_type=jnp.float32) + b3_ref[...]
    o_ref[...] = out.astype(o_ref.dtype)


# ----------------------------------- wrapper -----------------------------------

def linear_net_multi_forward(x, params, *, compute_dtype=jnp.float32,
                             batch_tile=128, bn_eps=1e-5):
    """x: (B, input_dim) float32. params: dict of weights/biases/bn params.

    compute_dtype: operand dtype for the three matmuls (f32, or bf16 on
    v6e/v7x for ~2x MXU throughput and half the weight DMA bytes).
    """
    f32 = jnp.float32
    B, D_in = x.shape
    D_h = params["w1"].shape[1]
    C = params["w3"].shape[1]

    # Lane-dense padding: feature dims -> multiples of 128, batch -> tile multiple.
    D_in_p = _round_up(max(D_in, 128), 128)
    D_h_p = _round_up(max(D_h, 128), 128)
    C_p = _round_up(max(C, 128), 128)
    TB = min(batch_tile, _round_up(B, 8))
    B_p = _round_up(B, TB)
    G = B_p // TB

    def pad2(a, rows, cols, dtype=f32):
        a = a.astype(f32)
        return jnp.pad(a, ((0, rows - a.shape[0]), (0, cols - a.shape[1]))).astype(dtype)

    x_p = pad2(x, B_p, D_in_p, compute_dtype)
    w1 = pad2(params["w1"], D_in_p, D_h_p, compute_dtype)
    b1 = pad2(params["b1"], 1, D_h_p)
    w2 = pad2(params["w2"], D_h_p, D_h_p, compute_dtype)
    b2 = pad2(params["b2"], 1, D_h_p)
    w3 = pad2(params["w3"], D_h_p, C_p, compute_dtype)
    b3 = pad2(params["b3"], 1, C_p)
    gamma = pad2(params["gamma"], 1, D_h_p)
    beta = pad2(params["beta"], 1, D_h_p)

    isz = jnp.dtype(compute_dtype).itemsize

    # ---------------- stage 1 ----------------
    blk1 = (TB * D_in_p * isz + D_in_p * D_h_p * isz + D_h_p * 4
            + TB * D_h_p * isz + 2 * D_h_p * 4)
    cost1 = pl.CostEstimate(
        flops=2 * B_p * D_in_p * D_h_p,
        transcendentals=0,
        bytes_accessed=(B_p * D_in_p * isz + D_in_p * D_h_p * isz
                        + B_p * D_h_p * isz + 2 * G * D_h_p * 4))

    h1, psum, psumsq = pl.pallas_call(
        functools.partial(_stage1_kernel, valid_b=B, tile_b=TB),
        grid=(G,),
        in_specs=[
            pl.BlockSpec((TB, D_in_p), lambda i: (i, 0)),
            pl.BlockSpec((D_in_p, D_h_p), lambda i: (0, 0)),
            pl.BlockSpec((1, D_h_p), lambda i: (0, 0)),
        ],
        out_specs=(
            pl.BlockSpec((TB, D_h_p), lambda i: (i, 0)),
            pl.BlockSpec((1, 1, D_h_p), lambda i: (i, 0, 0)),
            pl.BlockSpec((1, 1, D_h_p), lambda i: (i, 0, 0)),
        ),
        out_shape=(
            jax.ShapeDtypeStruct((B_p, D_h_p), compute_dtype),
            jax.ShapeDtypeStruct((G, 1, D_h_p), f32),
            jax.ShapeDtypeStruct((G, 1, D_h_p), f32),
        ),
        compiler_params=pltpu.CompilerParams(
            dimension_semantics=("parallel",),
            vmem_limit_bytes=_vmem_limit(blk1)),
        cost_estimate=cost1,
    )(x_p, w1, b1)

    # Full-batch BN statistics from per-tile partials (tiny XLA reduction), f32.
    total = jnp.sum(psum[:, 0, :], axis=0, keepdims=True)
    total_sq = jnp.sum(psumsq[:, 0, :], axis=0, keepdims=True)
    mean = total / B
    var = jnp.maximum(total_sq / B - mean * mean, 0.0)  # biased var, like PyTorch fwd
    inv_std = jax.lax.rsqrt(var + bn_eps)
    scale = gamma * inv_std
    shift = beta - mean * scale

    # ---------------- stage 2 ----------------
    blk2 = (TB * D_h_p * isz + 2 * D_h_p * 4
            + D_h_p * D_h_p * isz + D_h_p * 4
            + D_h_p * C_p * isz + C_p * 4 + TB * C_p * 4)
    cost2 = pl.CostEstimate(
        flops=2 * B_p * D_h_p * (D_h_p + C_p),
        transcendentals=0,
        bytes_accessed=(B_p * D_h_p * isz + D_h_p * (D_h_p + C_p) * isz
                        + B_p * C_p * 4))

    out_p = pl.pallas_call(
        _stage2_kernel,
        grid=(G,),
        in_specs=[
            pl.BlockSpec((TB, D_h_p), lambda i: (i, 0)),
            pl.BlockSpec((1, D_h_p), lambda i: (0, 0)),
            pl.BlockSpec((1, D_h_p), lambda i: (0, 0)),
            pl.BlockSpec((D_h_p, D_h_p), lambda i: (0, 0)),
            pl.BlockSpec((1, D_h_p), lambda i: (0, 0)),
            pl.BlockSpec((D_h_p, C_p), lambda i: (0, 0)),
            pl.BlockSpec((1, C_p), lambda i: (0, 0)),
        ],
        out_specs=pl.BlockSpec((TB, C_p), lambda i: (i, 0)),
        out_shape=jax.ShapeDtypeStruct((B_p, C_p), f32),
        compiler_params=pltpu.CompilerParams(
            dimension_semantics=("parallel",),
            vmem_limit_bytes=_vmem_limit(blk2)),
        cost_estimate=cost2,
    )(h1, scale, shift, w2, b2, w3, b3)

    return out_p[:B, :C]


# ------------------------------ params / reference ------------------------------

def init_params(key, input_dim, inter_dim, num_classes):
    """Deterministic init mimicking PyTorch Linear defaults (U(-1/sqrt(fan_in), +))."""
    ks = jax.random.split(key, 6)

    def lin(kw, kb, fan_in, fan_out):
        bound = 1.0 / jnp.sqrt(fan_in)
        w = jax.random.uniform(kw, (fan_in, fan_out), jnp.float32, -bound, bound)
        b = jax.random.uniform(kb, (1, fan_out), jnp.float32, -bound, bound)
        return w, b

    w1, b1 = lin(ks[0], ks[1], input_dim, inter_dim)
    w2, b2 = lin(ks[2], ks[3], inter_dim, inter_dim)
    w3, b3 = lin(ks[4], ks[5], inter_dim, num_classes)
    gamma = jnp.ones((1, inter_dim), jnp.float32)
    beta = jnp.zeros((1, inter_dim), jnp.float32)
    return dict(w1=w1, b1=b1, w2=w2, b2=b2, w3=w3, b3=b3, gamma=gamma, beta=beta)


def _reference(x, p):
    h1 = jnp.maximum(x @ p["w1"] + p["b1"], 0.0)
    mean = jnp.mean(h1, axis=0, keepdims=True)
    var = jnp.mean((h1 - mean) ** 2, axis=0, keepdims=True)
    h1n = (h1 - mean) * jax.lax.rsqrt(var + 1e-5) * p["gamma"] + p["beta"]
    h2 = jnp.maximum(h1n @ p["w2"] + p["b2"], 0.0)
    return h2 @ p["w3"] + p["b3"]


if __name__ == "__main__":
    k_x, k_p, k_x2, k_p2 = jax.random.split(jax.random.PRNGKey(0), 4)

    # ---- small f32 configuration (toy sizes implied by the module) ----
    B, D_in, D_h, C = 8, 32, 32, 8
    x = jax.random.normal(k_x, (B, D_in), jnp.float32)
    params = init_params(k_p, D_in, D_h, C)

    out = jax.block_until_ready(linear_net_multi_forward(x, params))
    ref = _reference(x, params)
    assert out.shape == (B, C), out.shape
    assert jnp.allclose(out, ref, atol=5e-4, rtol=5e-4), "f32 mismatch vs reference"

    # ---- gridded bf16 path: multiple batch tiles + non-multiple-of-tile batch ----
    B2, D_in2, D_h2, C2 = 300, 160, 256, 10
    x2 = jax.random.normal(k_x2, (B2, D_in2), jnp.float32)
    params2 = init_params(k_p2, D_in2, D_h2, C2)

    out2 = jax.block_until_ready(
        linear_net_multi_forward(x2, params2, compute_dtype=jnp.bfloat16))
    ref2 = _reference(x2, params2)
    assert out2.shape == (B2, C2), out2.shape
    assert bool(jnp.all(jnp.isfinite(out2)))
    assert jnp.allclose(out2, ref2, atol=0.15, rtol=0.15), "bf16 mismatch vs reference"

    print("KERNEL_OK")
</pallas_src>

<mosaic_0001>
module attributes {stable_mosaic.version = 11 : i64} {
  func.func @_stage1_kernel(%arg0: i32, %arg1: memref<8x128xf32, #tpu.memory_space<vmem>>, %arg2: memref<128x128xf32, #tpu.memory_space<vmem>>, %arg3: memref<1x128xf32, #tpu.memory_space<vmem>>, %arg4: memref<8x128xf32, #tpu.memory_space<vmem>>, %arg5: memref<1x1x128xf32, #tpu.memory_space<vmem>>, %arg6: memref<1x1x128xf32, #tpu.memory_space<vmem>>) attributes {dimension_semantics = [#tpu.dimension_semantics<parallel>], iteration_bounds = array<i64: 1>, scalar_prefetch = 0 : i64, scratch_operands = 0 : i64, tpu.core_type = #tpu.core_type<tc>, window_params = [{transform_indices = @transform_0, window_bounds = array<i64: 8, 128>}, {pipeline_mode = #tpu.pipeline_mode<synchronous>, transform_indices = @transform_1, window_bounds = array<i64: 128, 128>}, {pipeline_mode = #tpu.pipeline_mode<synchronous>, transform_indices = @transform_2, window_bounds = array<i64: 1, 128>}, {transform_indices = @transform_3, window_bounds = array<i64: 8, 128>}, {transform_indices = @transform_4, window_bounds = array<i64: 1, 1, 128>}, {transform_indices = @transform_5, window_bounds = array<i64: 1, 1, 128>}]} {
    %c0 = arith.constant 0 : index
    %c0_0 = arith.constant 0 : index
    %0 = vector.load %arg1[%c0, %c0_0] : memref<8x128xf32, #tpu.memory_space<vmem>>, vector<8x128xf32>
    %c0_1 = arith.constant 0 : index
    %c0_2 = arith.constant 0 : index
    %1 = vector.load %arg2[%c0_1, %c0_2] : memref<128x128xf32, #tpu.memory_space<vmem>>, vector<128x128xf32>
    %cst = arith.constant dense<0.000000e+00> : vector<8x128xf32>
    %2 = tpu.matmul %0, %1, %cst {dimension_numbers = #tpu.dot_dimension_numbers<[1], [0], [0], [1], [0, 0, 1, 1], [], []>} : vector<8x128xf32>, vector<128x128xf32>, vector<8x128xf32> -> vector<8x128xf32>
    %c0_3 = arith.constant 0 : index
    %c0_4 = arith.constant 0 : index
    %3 = vector.load %arg3[%c0_3, %c0_4] : memref<1x128xf32, #tpu.memory_space<vmem>>, vector<1x128xf32>
    %4 = vector.broadcast %3 : vector<1x128xf32> to vector<8x128xf32>
    %5 = arith.addf %2, %4 : vector<8x128xf32>
    %cst_5 = arith.constant 0.000000e+00 : f32
    %6 = vector.broadcast %cst_5 : f32 to vector<8x128xf32>
    %7 = arith.maximumf %5, %6 : vector<8x128xf32>
    %c0_6 = arith.constant 0 : index
    %c0_7 = arith.constant 0 : index
    %8 = vector.load %arg4[%c0_6, %c0_7] : memref<8x128xf32, #tpu.memory_space<vmem>>, vector<8x128xf32>
    tpu.vector_store %arg4[%c0_6, %c0_7], %7 {strides = array<i32>} : memref<8x128xf32, #tpu.memory_space<vmem>>, vector<8x128xf32>,
    %c8_i32 = arith.constant 8 : i32
    %9 = arith.muli %arg0, %c8_i32 : i32
    %10 = tpu.iota {dimensions = array<i32: 0>} : vector<8x128xi32>
    %11 = vector.broadcast %9 : i32 to vector<8x128xi32>
    %12 = arith.addi %11, %10 : vector<8x128xi32>
    %c8_i32_8 = arith.constant 8 : i32
    %13 = vector.broadcast %c8_i32_8 : i32 to vector<8x128xi32>
    %14 = arith.cmpi slt, %12, %13 : vector<8x128xi32>
    %cst_9 = arith.constant 0.000000e+00 : f32
    %15 = vector.broadcast %cst_9 : f32 to vector<8x128xf32>
    %16 = arith.select %14, %7, %15 : vector<8x128xi1>, vector<8x128xf32>
    %cst_10 = arith.constant dense<0.000000e+00> : vector<128xf32>
    %17 = vector.multi_reduction <add>, %16, %cst_10 [0] : vector<8x128xf32> to vector<128xf32>
    %18 = vector.shape_cast %17 : vector<128xf32> to vector<1x128xf32>
    %19 = vector.shape_cast %18 : vector<1x128xf32> to vector<1x1x128xf32>
    %c0_11 = arith.constant 0 : index
    %c0_12 = arith.constant 0 : index
    %c0_13 = arith.constant 0 : index
    %20 = vector.load %arg5[%c0_11, %c0_12, %c0_13] : memref<1x1x128xf32, #tpu.memory_space<vmem>>, vector<1x1x128xf32>
    tpu.vector_store %arg5[%c0_11, %c0_12, %c0_13], %19 {strides = array<i32>} : memref<1x1x128xf32, #tpu.memory_space<vmem>>, vector<1x1x128xf32>,
    %21 = arith.mulf %16, %16 : vector<8x128xf32>
    %cst_14 = arith.constant dense<0.000000e+00> : vector<128xf32>
    %22 = vector.multi_reduction <add>, %21, %cst_14 [0] : vector<8x128xf32> to vector<128xf32>
    %23 = vector.shape_cast %22 : vector<128xf32> to vector<1x128xf32>
    %24 = vector.shape_cast %23 : vector<1x128xf32> to vector<1x1x128xf32>
    %c0_15 = arith.constant 0 : index
    %c0_16 = arith.constant 0 : index
    %c0_17 = arith.constant 0 : index
    %25 = vector.load %arg6[%c0_15, %c0_16, %c0_17] : memref<1x1x128xf32, #tpu.memory_space<vmem>>, vector<1x1x128xf32>
    tpu.vector_store %arg6[%c0_15, %c0_16, %c0_17], %24 {strides = array<i32>} : memref<1x1x128xf32, #tpu.memory_space<vmem>>, vector<1x1x128xf32>,
    return
  }
  func.func @transform_0(%arg0: i32) -> (i32, i32) {
    %c0_i32 = arith.constant 0 : i32
    %c0_i32_0 = arith.constant 0 : i32
    return %arg0, %c0_i32 : i32, i32
  }
  func.func @transform_1(%arg0: i32) -> (i32, i32) {
    %c0_i32 = arith.constant 0 : i32
    %c0_i32_0 = arith.constant 0 : i32
    %c0_i32_1 = arith.constant 0 : i32
    return %c0_i32, %c0_i32_0 : i32, i32
  }
  func.func @transform_2(%arg0: i32) -> (i32, i32) {
    %c0_i32 = arith.constant 0 : i32
    %c0_i32_0 = arith.constant 0 : i32
    %c0_i32_1 = arith.constant 0 : i32
    return %c0_i32, %c0_i32_0 : i32, i32
  }
  func.func @transform_3(%arg0: i32) -> (i32, i32) {
    %c0_i32 = arith.constant 0 : i32
    %c0_i32_0 = arith.constant 0 : i32
    return %arg0, %c0_i32 : i32, i32
  }
  func.func @transform_4(%arg0: i32) -> (i32, i32, i32) {
    %c0_i32 = arith.constant 0 : i32
    %c0_i32_0 = arith.constant 0 : i32
    %c0_i32_1 = arith.constant 0 : i32
    return %arg0, %c0_i32, %c0_i32_0 : i32, i32, i32
  }
  func.func @transform_5(%arg0: i32) -> (i32, i32, i32) {
    %c0_i32 = arith.constant 0 : i32
    %c0_i32_0 = arith.constant 0 : i32
    %c0_i32_1 = arith.constant 0 : i32
    return %arg0, %c0_i32, %c0_i32_0 : i32, i32, i32
  }
}

</mosaic_0001>

<bundles_post_ra>
// kernel: tpu_custom_call.1
= control target key start
LH: loop header
LB: loop body
LE: loop exit
PB: predicated region body
PF: predicated region fallthrough
CT: control target
= control target key end

     0   :  { %11 = vsyncpa [#allocation3], 0  ;;  %s354_s0 = inlined_call_operand.hbm [shape: f32[8,128], index: 0, kind: input, shape index: {}]   ;;  %s355_s1 = inlined_call_operand.hbm [shape: f32[128,128], index: 1, kind: input, shape index: {}]   ;;  %s356_s2 = inlined_call_operand.vmem [shape: f32[1,128], index: 2, kind: input, shape index: {}]   ;;  %s357_s3 = inlined_call_operand.hbm [shape: f32[8,128], index: 3, kind: output, shape index: {0}]   ;;  %s358_s4 = inlined_call_operand.hbm [shape: f32[1,1,128], index: 4, kind: output, shape index: {1}]   ;;  %s359_s5 = inlined_call_operand.hbm [shape: f32[1,1,128], index: 5, kind: output, shape index: {2}]  }
   0x1   :  { %12 = vsyncpa [#allocation6], 0 }
   0x2   :  { %13 = vsyncpa [#allocation4], 0 }
   0x3   :  { %14 = vsyncpa [#allocation9], 0  ;;  %s20_s20 = sshll.u32 %s354_s0, 4  ;;  %s299_s21 = smov [#allocation2]   ;;  %s21_s20 = int_to_ptr.hbm [resolvable:$true] %s20_s20 }
   0x4   :  { %s22_s22 = sshll.u32 %s299_s21, 4  ;;  %s30_s25 = sshll.u32 %s355_s1, 4  ;;  %s23_s22 = int_to_ptr.vmem [resolvable:$true] %s22_s22  ;;  %s31_s25 = int_to_ptr.hbm [resolvable:$true] %s30_s25 }
   0x5   :  { %25 = dma.hbm_to_vmem [thread:$0]  %s21_s20, 128, %s23_s22, [#allocation3]  }
   0x6   :  { %s300_s26 = smov [#allocation5]   ;;  %s301_s28 = smov 128  }
   0x7   :  { %s32_s27 = sshll.u32 %s300_s26, 4  ;;  %s302_s29 = smov 8   ;;  %s33_s27 = int_to_ptr.vmem [resolvable:$true] %s32_s27 }
   0x8   :  { %38 = dma.hbm_to_vmem [thread:$0]  %s31_s25, 2048, %s33_s27, [#allocation6], %s301_s28, %s301_s28, %s302_s29  }
   0x9   :  { %291 = dma.done.wait [#allocation3], 128  }
   0xa   :  { %292 = vsyncadd [#allocation3], 4294967168 }
   0xb   :  { %293 = dma.done.wait [#allocation6], 2048  }
   0xc   :  { %294 = vsyncadd [#allocation6], 4294965248  ;;  %v65_v0 = vld [vmem:[#allocation5 + $0x78] sm:$0xff]  ;;  %v64_v1 = vld [vmem:[#allocation5 + $0x70] sm:$0xff]  ;;  %s303_s30 = smov [#allocation7]   ;;  %s121_s9 = sshll.u32 %s357_s3, 4  ;;  %s122_s9 = int_to_ptr.hbm [resolvable:$true] %s121_s9 }
   0xd   :  { %70 = vmatpush.msra.mxu0 %v65_v0  ;;  %v63_v2 = vld [vmem:[#allocation5 + $0x68] sm:$0xff]  ;;  %v62_v3 = vld [vmem:[#allocation5 + $0x60] sm:$0xff]  ;;  %v61_v4 = vld [vmem:[#allocation5 + $0x58] sm:$0xff]  ;;  %s119_s6 = sshll.u32 %s303_s30, 4  ;;  %s132_s3 = sshll.u32 %s358_s4, 4  ;;  %s120_s6 = int_to_ptr.vmem [resolvable:$true] %s119_s6  ;;  %s133_s3 = int_to_ptr.hbm [resolvable:$true] %s132_s3 }
   0xe   :  { %v60_v5 = vld [vmem:[#allocation5 + $0x50] sm:$0xff]  ;;  %v59_v6 = vld [vmem:[#allocation5 + $0x48] sm:$0xff]  ;;  %v58_v7 = vld [vmem:[#allocation5 + $0x40] sm:$0xff]  ;;  %s305_s13 = smov [#allocation10]   ;;  %s143_s17 = sshll.u32 %s359_s5, 4  ;;  %s144_s17 = int_to_ptr.hbm [resolvable:$true] %s143_s17 }
   0xf   :  { %71 = vmatpush.msra.mxu0 %v64_v1  ;;  %v57_v8 = vld [vmem:[#allocation5 + $0x38] sm:$0xff]  ;;  %v56_v9 = vld [vmem:[#allocation5 + $0x30] sm:$0xff]  ;;  %v55_v10 = vld [vmem:[#allocation5 + $0x28] sm:$0xff]  ;;  %s141_s14 = sshll.u32 %s305_s13, 4  ;;  %s142_s14 = int_to_ptr.vmem [resolvable:$true] %s141_s14 }
  0x10   :  { %v54_v11 = vld [vmem:[#allocation5 + $0x20] sm:$0xff]  ;;  %v53_v12 = vld [vmem:[#allocation5 + $0x18] sm:$0xff]  ;;  %v52_v13 = vld [vmem:[#allocation5 + $0x10] sm:$0xff] }
  0x11   :  { %72 = vmatpush.msra.mxu0 %v63_v2  ;;  %v51_v14 = vld [vmem:[#allocation5 + $0x8] sm:$0xff]  ;;  %v50_v15 = vld [vmem:[#allocation5] sm:$0xff]  ;;  %v49_v16 = vld [vmem:[#allocation2] sm:$0xff] }
  0x12   :  { %v170_v17 = vld [vmem:[%s356_s2] ss:$0 sm:$0xff]  ;;  %s304_s2 = smov [#allocation8]  }
  0x13   :  { %73 = vmatpush.msra.mxu0 %v62_v3  ;;  %s130_s10 = sshll.u32 %s304_s2, 4  ;;  %s131_s10 = int_to_ptr.vmem [resolvable:$true] %s130_s10 }
  0x15   :  { %74 = vmatpush.msra.mxu0 %v61_v4 }
  0x17   :  { %75 = vmatpush.msra.mxu0 %v60_v5 }
  0x19   :  { %76 = vmatpush.msra.mxu0 %v59_v6 }
  0x1b   :  { %77 = vmatpush.msra.mxu0 %v58_v7 }
  0x1d   :  { %78 = vmatpush.msra.mxu0 %v57_v8 }
  0x1f   :  { %79 = vmatpush.msra.mxu0 %v56_v9 }
  0x21   :  { %80 = vmatpush.msra.mxu0 %v55_v10 }
  0x23   :  { %81 = vmatpush.msra.mxu0 %v54_v11 }
  0x25   :  { %82 = vmatpush.msra.mxu0 %v53_v12 }
  0x27   :  { %83 = vmatpush.msra.mxu0 %v52_v13 }
  0x29   :  { %84 = vmatpush.msra.mxu0 %v51_v14 }
  0x2b   :  { %85 = vmatpush.msra.mxu0 %v50_v15 }
  0x2c   :  { %86 = vmatmul.f32.vlgmr.msra.gmra.mxu0 %v49_v16 }
  0xa9   :  { %v87_v18 = vpop.f32.mrf.mxu0 }
  0xaa   :  { %v88_v19 = vadd.f32 %v170_v17, %v87_v18 }
  0xac   :  { %v90_v20 = vmax.f32 %v88_v19, 0.0 }
  0xae   :  { %v99_v21 = vrot.slane %v90_v20, 4  ;;  %v106_v22 = vmul.f32 %v90_v20, %v90_v20  ;;  %91 = vst [vmem:[#allocation7] sm:$0xff] %v90_v20 }
  0xaf   :  { %124 = dma.vmem_to_hbm [thread:$0]  %s120_s6, 128, %s122_s9, [#allocation4]  }
  0xb0   :  { %v100_v23 = vadd.f32 %v99_v21, %v90_v20  ;;  %v107_v24 = vrot.slane %v106_v22, 4 }
  0xb2   :  { %v108_v25 = vadd.f32 %v107_v24, %v106_v22  ;;  %v101_v26 = vrot.slane %v100_v23, 2 }
  0xb4   :  { %v102_v27 = vadd.f32 %v101_v26, %v100_v23  ;;  %v109_v28 = vrot.slane %v108_v25, 2 }
  0xb6   :  { %v103_v29 = vrot.slane %v102_v27, 1  ;;  %v110_v30 = vadd.f32 %v109_v28, %v108_v25 }
  0xb8   :  { %v104_v31 = vadd.f32 %v103_v29, %v102_v27  ;;  %v111_v32 = vrot.slane %v110_v30, 1 }
  0xba   :  { %105 = vst [vmem:[#allocation8] sm:$0x1] %v104_v31  ;;  %v112_v33 = vadd.f32 %v111_v32, %v110_v30 }
  0xbb   :  { %135 = dma.vmem_to_hbm [thread:$0]  %s131_s10, 16, %s133_s3, [#allocation9]  }
  0xbc   :  { %113 = vst [vmem:[#allocation10] sm:$0x1] %v112_v33 }
  0xbd   :  { %146 = dma.vmem_to_hbm [thread:$0]  %s142_s14, 16, %s144_s17, [#allocation9]  }
  0xbe   :  { %295 = dma.done.wait [#allocation4], 128  }
  0xbf   :  { %296 = vsyncadd [#allocation4], 4294967168 }
  0xc0   :  { %297 = dma.done.wait [#allocation9], 32  }
  0xc1   :  { %298 = vsyncadd [#allocation9], 4294967264 }
  0xc2   :  { %159 = vsyncpa [#allocation3], 1 }
  0xc3   :  { %160 = vsyncpa [#allocation6], 1 }
  0xc4   :  { %161 = vsyncpa [#allocation4], 1 }
  0xc5   :  { %162 = vsyncpa [#allocation9], 1 }

</bundles_post_ra>
